<compile_context>
chip_gen: v6e
topology: v6e:2x2x1
jax: 0.10.0
libtpu: 0.0.40
codegen_flags: <defaults>
</compile_context>

<pallas_src>
import math

import jax
import jax.numpy as jnp
from jax.experimental import pallas as pl
from jax.experimental.pallas import tpu as pltpu


def _round_up(x: int, m: int) -> int:
    return ((x + m - 1) // m) * m


def _vmem_capacity_bytes() -> int:
    """Physical VMEM per TensorCore; conservative fallback if the query is unavailable."""
    try:
        cap = int(pltpu.get_tpu_info().vmem_capacity_bytes)
        if cap > 0:
            return cap
    except Exception:
        pass
    return 64 * 1024 * 1024  # v7x per-TensorCore VMEM (smallest of v5e/v6e/v7x)


def _convtr_kernel(x_ref, w_ref, b_ref, o_ref):
    # x_ref: (1, Mtot*Cin, U_tile)   tap-stacked input tile (lane dim = time, 128-aligned)
    # w_ref: (row_tile, Mtot*Cin)    phase-expanded correlation weights (row chunk)
    # b_ref: (row_tile, 1)           f32 bias replicated per phase (row chunk)
    # o_ref: (1, row_tile, U_tile)   phase-major output tile (lane dim = time)
    y = jnp.dot(w_ref[...], x_ref[0], preferred_element_type=jnp.float32)
    o_ref[0] = (y + b_ref[...]).astype(o_ref.dtype)


def pack_convtr_params(weight, bias, *, stride: int, causal: bool,
                       trim_right_ratio: float = 1.0, compute_dtype=None):
    """Pack ConvTranspose1d parameters into the polyphase correlation layout.

    weight: (Cin, Cout, K) PyTorch ConvTranspose1d weight; bias: (Cout,).
    Returns (w_all, b_all, meta). Call once per module (hoist out of per-chunk calls).
    """
    Cin, Cout, K = weight.shape
    S = int(stride)
    assert K >= S, "kernel_size < stride is not supported by this module"
    assert causal or trim_right_ratio == 1.0
    assert 0.0 <= trim_right_ratio <= 1.0

    padding_total = K - S
    if causal:
        pad_right = math.ceil(padding_total * trim_right_ratio)
        pad_left = padding_total - pad_right
    else:
        pad_right = padding_total // 2
        pad_left = padding_total - pad_right

    n_up = -(-K // S)                       # ceil(K/S): max non-zero taps per phase
    D = (S - 1 + pad_left) // S             # pad_left carry into earlier frames
    Mtot = n_up + D                         # taps per phase incl. the carry
    R = S * Cout
    R_pad = _round_up(R, 8)                 # sublane-aligned output rows

    w_dtype = jnp.dtype(compute_dtype) if compute_dtype is not None else jnp.dtype(weight.dtype)

    # W_all[r*Cout+co, m*Cin+ci] = weight[ci, co, (m-D)*S + r + pad_left]  (0 if tap OOB)
    zero_blk = jnp.zeros((Cout, Cin), weight.dtype)
    rows = []
    for r in range(S):
        blks = []
        for m in range(Mtot):
            k = (m - D) * S + r + pad_left
            blks.append(weight[:, :, k].T if 0 <= k < K else zero_blk)
        rows.append(jnp.concatenate(blks, axis=1))        # (Cout, Mtot*Cin)
    w_all = jnp.concatenate(rows, axis=0)                  # (R, Mtot*Cin)
    b_all = jnp.tile(bias.astype(jnp.float32), S).reshape(R, 1)
    if R_pad != R:
        w_all = jnp.pad(w_all, ((0, R_pad - R), (0, 0)))
        b_all = jnp.pad(b_all, ((0, R_pad - R), (0, 0)))
    w_all = w_all.astype(w_dtype)

    meta = dict(Cin=Cin, Cout=Cout, K=K, S=S, n_up=n_up, D=D, Mtot=Mtot,
                R=R, R_pad=R_pad, compute_dtype=w_dtype)
    return w_all, b_all, meta


def streamable_conv_transpose_1d(x_ncl, weight=None, bias=None, *, stride=None,
                                 causal: bool = False, trim_right_ratio: float = 1.0,
                                 packed_params=None, compute_dtype=None,
                                 max_time_tile=None):
    """Equivalent of StreamableConvTranspose1d.forward (norm='none').

    x_ncl: (B, Cin, T). Returns (B, Cout, T*stride).
    Either pass (weight, bias, stride, causal, trim_right_ratio) or a precomputed
    packed_params from pack_convtr_params (preferred for streaming inference).
    """
    if packed_params is None:
        assert weight is not None and bias is not None and stride is not None
        packed_params = pack_convtr_params(weight, bias, stride=stride, causal=causal,
                                           trim_right_ratio=trim_right_ratio,
                                           compute_dtype=compute_dtype)
    w_all, b_all, meta = packed_params

    B, Cin, T = x_ncl.shape
    assert Cin == meta["Cin"]
    S, Cout = meta["S"], meta["Cout"]
    n_up, D, Mtot = meta["n_up"], meta["D"], meta["Mtot"]
    R, R_pad = meta["R"], meta["R_pad"]
    MtotCin = Mtot * Cin
    cdt = meta["compute_dtype"]
    out_dtype = x_ncl.dtype
    L_out = T * S

    x_esize = jnp.dtype(cdt).itemsize
    w_esize = x_esize
    o_esize = jnp.dtype(out_dtype).itemsize

    # ---- time tiling: lane-dense tiles sized against a per-chip VMEM budget ----
    cap = _vmem_capacity_bytes()
    budget = int(cap * 0.70)
    per_col = 2 * (MtotCin * x_esize + R_pad * o_esize)          # dbl-buffered input + output / column
    fixed = 2 * (R_pad * MtotCin * w_esize + R_pad * 4)          # dbl-buffered weights + bias
    # TODO(synk): pipeline_mode=pl.Buffered(1) on the (often grid-invariant) weight/bias blocks
    # would halve their footprint; kept at the default for lowering portability.
    if budget > fixed:
        u_cap = max(128, ((budget - fixed) // max(per_col, 1)) // 128 * 128)
    else:
        u_cap = 128
    u_cap = min(u_cap, 1024)
    if max_time_tile is not None:
        u_cap = max(128, min(u_cap, (int(max_time_tile) // 128) * 128))
    U_tile = min(u_cap, _round_up(T, 128))
    Tg = _round_up(T, U_tile)
    nU = Tg // U_tile
    assert Tg % U_tile == 0 and U_tile % 128 == 0

    # ---- row split: keep both v7x TensorCores busy for streaming-sized launches ----
    if B * nU == 1 and R_pad % 16 == 0:
        row_tile, nR = R_pad // 2, 2
    else:
        row_tile, nR = R_pad, 1

    # ---- input prep: pad + tap-stack (bounded VMEM, 128-aligned kernel loads) ----
    # Zero-pad time: (n_up-1) frames on the left (early-phase taps), D + tile alignment right.
    x_pad = jnp.pad(x_ncl, ((0, 0), (0, 0), (n_up - 1, D + (Tg - T)))).astype(cdt)
    # xcol[b, m*Cin+ci, t] = x_pad[b, ci, t + (Mtot-1-m)]
    # TODO(synk): a manual haloed DMA (pl.ANY + make_async_copy double-buffer) would avoid
    # materializing this Mtot-x stacked copy of the (comparatively small) input in HBM.
    if Mtot > 1:
        xcol = jnp.concatenate(
            [x_pad[:, :, (Mtot - 1 - m):(Mtot - 1 - m) + Tg] for m in range(Mtot)], axis=1)
    else:
        xcol = x_pad[:, :, :Tg]                              # (B, Mtot*Cin, Tg)

    flops = 2 * B * R_pad * MtotCin * Tg
    bytes_accessed = (xcol.size * x_esize + w_all.size * w_esize
                      + b_all.size * 4 + B * R_pad * Tg * o_esize)
    cost = pl.CostEstimate(flops=flops, transcendentals=0, bytes_accessed=int(bytes_accessed))

    vmem_limit = fixed + per_col * U_tile + (8 << 20)
    vmem_limit = max(vmem_limit, 32 << 20)
    vmem_limit = min(vmem_limit, int(cap * 0.9))

    y_ph = pl.pallas_call(
        _convtr_kernel,
        out_shape=jax.ShapeDtypeStruct((B, R_pad, Tg), out_dtype),
        grid=(B, nU, nR),
        in_specs=[
            pl.BlockSpec((1, MtotCin, U_tile), lambda b, u, r: (b, 0, u)),
            pl.BlockSpec((row_tile, MtotCin), lambda b, u, r: (r, 0)),
            pl.BlockSpec((row_tile, 1), lambda b, u, r: (r, 0)),
        ],
        out_specs=pl.BlockSpec((1, row_tile, U_tile), lambda b, u, r: (b, r, u)),
        compiler_params=pltpu.CompilerParams(
            dimension_semantics=("parallel", "parallel", "parallel"),
            vmem_limit_bytes=int(vmem_limit)),
        cost_estimate=cost,
    )(xcol, w_all, b_all)

    # Phase interleave: y[b, co, u*S + r] = y_ph[b, r*Cout + co, u]
    # TODO(synk): this (S, T)->(T, S) lane interleave is one extra XLA pass over the output;
    # an in-kernel version needs a strided lane scatter with no clean portable Mosaic lowering.
    y = y_ph[:, :R, :].reshape(B, S, Cout, Tg)
    y = jnp.transpose(y, (0, 2, 3, 1)).reshape(B, Cout, Tg * S)
    return y[:, :, :L_out].astype(out_dtype)


def _reference_forward(x_ncl, weight, bias, *, stride, causal, trim_right_ratio):
    """Pure-JAX reference of ConvTranspose1d + unpad1d (per-tap scatter-add)."""
    B, Cin, T = x_ncl.shape
    _, Cout, K = weight.shape
    L = (T - 1) * stride + K
    xf = x_ncl.astype(jnp.float32)
    wf = weight.astype(jnp.float32)
    y = jnp.zeros((B, Cout, L), jnp.float32)
    for k in range(K):
        contrib = jnp.einsum('bit,io->bot', xf, wf[:, :, k])
        y = y.at[:, :, k:k + (T - 1) * stride + 1:stride].add(contrib)
    y = y + bias.astype(jnp.float32)[None, :, None]
    padding_total = K - stride
    if causal:
        pad_right = math.ceil(padding_total * trim_right_ratio)
        pad_left = padding_total - pad_right
    else:
        pad_right = padding_total // 2
        pad_left = padding_total - pad_right
    return y[:, :, pad_left:L - pad_right]


if __name__ == "__main__":
    def _run_case(name, *, B, Cin, Cout, K, S, T, causal, trim_right_ratio=1.0,
                  compute_dtype=None, max_time_tile=None, seed=0,
                  atol=1e-4, rtol=1e-4, use_packed=False):
        key = jax.random.PRNGKey(seed)
        kx, kw, kb = jax.random.split(key, 3)
        fan_in = Cout * K
        bound = 1.0 / math.sqrt(fan_in)
        weight = jax.random.uniform(kw, (Cin, Cout, K), minval=-bound, maxval=bound,
                                    dtype=jnp.float32)
        bias = jax.random.uniform(kb, (Cout,), minval=-bound, maxval=bound,
                                  dtype=jnp.float32)
        x = jax.random.normal(kx, (B, Cin, T), dtype=jnp.float32)

        if use_packed:  # streaming-style: pack weights once, reuse per chunk
            packed = pack_convtr_params(weight, bias, stride=S, causal=causal,
                                        trim_right_ratio=trim_right_ratio,
                                        compute_dtype=compute_dtype)
            y = streamable_conv_transpose_1d(x, packed_params=packed,
                                             max_time_tile=max_time_tile)
        else:
            y = streamable_conv_transpose_1d(x, weight, bias, stride=S, causal=causal,
                                             trim_right_ratio=trim_right_ratio,
                                             compute_dtype=compute_dtype,
                                             max_time_tile=max_time_tile)
        y = jax.block_until_ready(y)

        y_ref = _reference_forward(x, weight, bias, stride=S, causal=causal,
                                   trim_right_ratio=trim_right_ratio)
        assert y.shape == y_ref.shape, (name, y.shape, y_ref.shape)
        err = float(jnp.max(jnp.abs(y - y_ref)))
        assert jnp.allclose(y, y_ref, atol=atol, rtol=rtol), (name, err)

    # 1) default config, hoisted param packing (streaming style)
    _run_case("causal_stream", B=2, Cin=4, Cout=8, K=8, S=4, T=16,
              causal=True, use_packed=True)
    # 2) non-causal branch (pad_left > 0, D > 0) + row-split path (B=1, single time tile)
    _run_case("noncausal_padleft", B=1, Cin=6, Cout=16, K=7, S=3, T=20, causal=False)
    # 3) multiple time tiles
    _run_case("long_multitile", B=2, Cin=4, Cout=8, K=8, S=4, T=300,
              causal=True, max_time_tile=128)
    # 4) bf16 compute path (f32 accumulation/bias/output), looser tolerance
    _run_case("bf16_compute", B=2, Cin=4, Cout=8, K=8, S=4, T=64, causal=True,
              compute_dtype=jnp.bfloat16, atol=2e-2, rtol=2e-2)
    # 5) causal with trim_right_ratio < 1 (pad_left carry) + row-split
    _run_case("causal_trim", B=1, Cin=4, Cout=8, K=8, S=4, T=24,
              causal=True, trim_right_ratio=0.5)

    print("KERNEL_OK")
</pallas_src>

<mosaic_0001>
module attributes {stable_mosaic.version = 11 : i64} {
  func.func @_convtr_kernel(%arg0: i32, %arg1: i32, %arg2: i32, %arg3: memref<1x8x128xf32, #tpu.memory_space<vmem>>, %arg4: memref<32x8xf32, #tpu.memory_space<vmem>>, %arg5: memref<32x1xf32, #tpu.memory_space<vmem>>, %arg6: memref<1x32x128xf32, #tpu.memory_space<vmem>>) attributes {dimension_semantics = [#tpu.dimension_semantics<parallel>, #tpu.dimension_semantics<parallel>, #tpu.dimension_semantics<parallel>], iteration_bounds = array<i64: 2, 1, 1>, scalar_prefetch = 0 : i64, scratch_operands = 0 : i64, tpu.core_type = #tpu.core_type<tc>, window_params = [{transform_indices = @transform_0, window_bounds = array<i64: 1, 8, 128>}, {transform_indices = @transform_1, window_bounds = array<i64: 32, 8>}, {transform_indices = @transform_2, window_bounds = array<i64: 32, 1>}, {transform_indices = @transform_3, window_bounds = array<i64: 1, 32, 128>}]} {
    %c0 = arith.constant 0 : index
    %c0_0 = arith.constant 0 : index
    %0 = vector.load %arg4[%c0, %c0_0] : memref<32x8xf32, #tpu.memory_space<vmem>>, vector<32x8xf32>
    %c0_1 = arith.constant 0 : index
    %c0_2 = arith.constant 0 : index
    %c0_3 = arith.constant 0 : index
    %1 = vector.load %arg3[%c0_1, %c0_2, %c0_3] : memref<1x8x128xf32, #tpu.memory_space<vmem>>, vector<1x8x128xf32>
    %2 = vector.shape_cast %1 : vector<1x8x128xf32> to vector<8x128xf32>
    %cst = arith.constant dense<0.000000e+00> : vector<32x128xf32>
    %3 = tpu.matmul %0, %2, %cst {dimension_numbers = #tpu.dot_dimension_numbers<[1], [0], [0], [1], [0, 0, 1, 1], [], []>} : vector<32x8xf32>, vector<8x128xf32>, vector<32x128xf32> -> vector<32x128xf32>
    %c0_4 = arith.constant 0 : index
    %c0_5 = arith.constant 0 : index
    %4 = vector.load %arg5[%c0_4, %c0_5] : memref<32x1xf32, #tpu.memory_space<vmem>>, vector<32x1xf32>
    %5 = vector.broadcast %4 : vector<32x1xf32> to vector<32x128xf32>
    %6 = arith.addf %3, %5 : vector<32x128xf32>
    %c0_6 = arith.constant 0 : index
    %c0_7 = arith.constant 0 : index
    %c0_8 = arith.constant 0 : index
    %7 = vector.load %arg6[%c0_6, %c0_7, %c0_8] : memref<1x32x128xf32, #tpu.memory_space<vmem>>, vector<1x32x128xf32>
    %8 = vector.shape_cast %7 : vector<1x32x128xf32> to vector<32x128xf32>
    %9 = vector.shape_cast %6 : vector<32x128xf32> to vector<1x32x128xf32>
    tpu.vector_store %arg6[%c0_6, %c0_7, %c0_8], %9 {strides = array<i32>} : memref<1x32x128xf32, #tpu.memory_space<vmem>>, vector<1x32x128xf32>,
    return
  }
  func.func @transform_0(%arg0: i32, %arg1: i32, %arg2: i32) -> (i32, i32, i32) {
    %c0_i32 = arith.constant 0 : i32
    %c0_i32_0 = arith.constant 0 : i32
    return %arg0, %c0_i32, %arg1 : i32, i32, i32
  }
  func.func @transform_1(%arg0: i32, %arg1: i32, %arg2: i32) -> (i32, i32) {
    %c0_i32 = arith.constant 0 : i32
    %c0_i32_0 = arith.constant 0 : i32
    return %arg2, %c0_i32 : i32, i32
  }
  func.func @transform_2(%arg0: i32, %arg1: i32, %arg2: i32) -> (i32, i32) {
    %c0_i32 = arith.constant 0 : i32
    %c0_i32_0 = arith.constant 0 : i32
    return %arg2, %c0_i32 : i32, i32
  }
  func.func @transform_3(%arg0: i32, %arg1: i32, %arg2: i32) -> (i32, i32, i32) {
    %c0_i32 = arith.constant 0 : i32
    return %arg0, %arg2, %arg1 : i32, i32, i32
  }
}

</mosaic_0001>

<bundles_post_ra>
// kernel: tpu_custom_call.1
= control target key start
LH: loop header
LB: loop body
LE: loop exit
PB: predicated region body
PF: predicated region fallthrough
CT: control target
= control target key end

     0   :  { %8 = vsyncpa [#allocation3], 0  ;;  %s841_s0 = inlined_call_operand.vmem [shape: f32[2,8,128], index: 0, kind: input, shape index: {}]   ;;  %s842_s1 = inlined_call_operand.vmem [shape: f32[32,8], index: 1, kind: input, shape index: {}]   ;;  %s843_s2 = inlined_call_operand.vmem [shape: f32[32,1], index: 2, kind: input, shape index: {}]   ;;  %s844_s3 = inlined_call_operand.hbm [shape: f32[2,32,128], index: 3, kind: output, shape index: {}]  }
   0x1   :  { %10 = vsyncpa [#allocation3 + $0x1], 0  ;;  %s699_s12 = smov 0   ;;  %s701_s13 = smov 0  }
   0x2   :  { %s703_s14 = smov 0   ;;  %s705_s15 = smov 0  }
   0x3   :  { %s707_s16 = smov 0   ;;  %s709_s17 = smov 0  }
   0x4 LB: > { %s503_s18 = sadd.s32 4294967295, %s673_s17   ;;  %s504_s19 = sadd.s32 4294967294, %s673_s17   ;;  %s673_s17 = sphi %s709_s17, %s16_s17   ;;  %s669_s16 = sphi %s707_s16, %s851_s16   ;;  %s665_s15 = sphi %s705_s15, %s850_s15   ;;  %s661_s14 = sphi %s703_s14, %s849_s14   ;;  %s657_s13 = sphi %s701_s13, %s848_s13   ;;  %s653_s12 = sphi %s699_s12, %s847_s12  }
   0x5   : > { %s35_s20 = sadd.s32 1, %s669_s16  ;;  %s126_s21 = sadd.s32 1, %s661_s14 }
   0x6   : > { %p37_p0 = scmp.ge.s32.totalorder %s35_s20, 2  ;;  %p136_p1 = scmp.ne.s32.totalorder %s661_s14, %s657_s13 }
   0x7   : > { %p137_p2 = scmp.eq.s32.totalorder %s503_s18, 1  ;;  %p142_p3 = scmp.ne.s32.totalorder %s657_s13, %s653_s12 }
   0x8   : > { %s853_s20 = smov (%p37_p0, %s35_s20), 0  ;;  %p143_p5 = scmp.eq.s32.totalorder %s504_s19, 1 }
   0x9   : > { %p739_p4 = por %p137_p2, %p136_p1  ;;  %s119_s23 = ssub.s32 %s669_s16, %s853_s20 }
   0xa   : > { %p509_p6 = scmp.ge.s32.totalorder %s673_s17, 1  ;;  %p124_p7 = scmp.eq.s32.totalorder %s119_s23, 0 }
   0xb   : > { %p746_p8 = por %p143_p5, %p142_p3  ;;  %p189_p9 = scmp.lt.s32.totalorder %s673_s17, 3 }
   0xc   : > { %s752_s25 = scalar_select %p124_p7, %s661_s14, %s126_s21  }
   0xd   : > { %p190_p10 = pnand %p509_p6, %p189_p9 }
   0xe   : > { %p225_p11 = scmp.lt.s32.totalorder (!%p190_p10), %s665_s15, 1  ;;  %s222_s30 = sand.u32 (!%p190_p10), 1, %s657_s13  }
   0xf   : > { %193 = sbr.rel (%p190_p10) target bundleno = 238 (0xee), region = 32  ;;  %s510_s4 = sshll.u32 (!%p190_p10), %s222_s30, 5 }
  0x10   : > { %s224_s5 = scalar_lea.vmem (!%p190_p10), [#allocation2], %s510_s4  ;;  %s676_s18 = smov (!%p190_p10), [#allocation2]  }
  0x11   : > { %s393_s6 = sshll.u32 (!%p190_p10), %s224_s5, 4  ;;  %s601_s19 = sshll.u32 (!%p190_p10), %s676_s18, 4  ;;  %s789_s6 = int_to_ptr.vmem [resolvable:$true] %s393_s6  ;;  %s602_s19 = int_to_ptr.vmem [resolvable:$false] %s601_s19 }
  0x12   : > { %s603_s21 = scalar_lea.vmem (!%p190_p10), %s602_s19, 1024  ;;  %p604_p1 = scmp.lt.s32.totalorder (!%p190_p10), %s789_s6, %s602_s19 }
  0x14   : > { %v245_v0 = vld [vmem:[%s842_s1] sm:$0xff]  ;;  %vm274_vm0 = vcmask 64512   ;;  %v247_v1 = vld [vmem:[%s842_s1 + $0x10] sm:$0xff]  ;;  %s226_s7 = scalar_select %p225_p11, %s665_s15, 1  ;;  %v675_v4 = vmov 0   ;;  %v246_v6 = vld [vmem:[%s842_s1 + $0x8] sm:$0xff] }
  0x15   : > { %529 = vmatprep.mubr.msk.f32.mxu0 %vm274_vm0, %v245_v0  ;;  %532 = vmatprep.mubr.msk.f32.mxu1 %vm274_vm0, %v247_v1  ;;  %v252_v2 = vld [vmem:[%s843_s2 + $0x10] sm:$0xff]  ;;  %v250_v3 = vld [vmem:[%s843_s2] sm:$0xff]  ;;  %v248_v7 = vld [vmem:[%s842_s1 + $0x18] sm:$0xff] }
  0x16   : > { %596 = vset.pattern.permute.xlu1 %v675_v4  ;;  %595 = vset.pattern.permute.xlu0 %v675_v4  ;;  %s511_s8 = sshll.u32 %s226_s7, 3  ;;  %v253_v8 = vld [vmem:[%s843_s2 + $0x18] sm:$0xff]  ;;  %v251_v9 = vld [vmem:[%s843_s2 + $0x8] sm:$0xff]  ;;  %s521_s7 = sshll.u32 %s665_s15, 9 }
  0x17   : > { %266 = vperm.xlu1 %596, %v252_v2   ;;  %256 = vperm.xlu0 %595, %v250_v3   ;;  %s231_s11 = scalar_lea.vmem %s841_s0, %s511_s8  ;;  %s794_s10 = scalar_lea.hbm %s844_s3, %s521_s7 }
  0x18   : > { %v249_v5 = vld [vmem:[%s231_s11] sm:$0xff]  ;;  %s796_s15 = scalar_lea.sflag [#allocation3], %s222_s30  ;;  %s597_s11 = scalar_lea.vmem %s789_s6, 512 }
  0x19   : > { %527 = vmatprep.subr.mxu0 %v249_v5  ;;  %535 = vmatprep.subr.mxu1 %v249_v5  ;;  %p598_p12 = scmp.ne.s32.totalorder %s789_s6, %s597_s11  ;;  %p605_p2 = scmp.lt.s32.totalorder %s603_s21, %s597_s11 }
  0x1a   : > { %528 = vmatpush3.msra.mxu0 %v249_v5  ;;  %536 = vmatpush3.msra.mxu1 %v249_v5 }
  0x1b   : > { %530 = vmatmul.mubr.msk.f32.vlgmr.msra.gmra.mxu0 %vm274_vm0, %v246_v6  ;;  %533 = vmatmul.mubr.msk.f32.vlgmr.msra.gmra.mxu1 %vm274_vm0, %v248_v7  ;;  %p599_p13 = pnand %p598_p12, %p739_p4  ;;  %p606_p3 = por %p605_p2, %p604_p1 }
  0x1c   : > { %271 = vperm.xlu1 %596, %v253_v8   ;;  %261 = vperm.xlu0 %595, %v251_v9  }
  0x1d   : > { %p600_p0 = pneg %p599_p13 }
  0x1f   : > { %p607_p5 = pnand %p606_p3, %p600_p0 }
  0x92   : > { %v267_v10 = vpop.permute.xlu1 %266  ;;  %v257_v11 = vpop.permute.xlu0 %256 }
  0x97   : > { %v272_v12 = vpop.permute.xlu1 %271  ;;  %v262_v13 = vpop.permute.xlu0 %261 }
  0xdb   : > { %v531_v14 = vpop.f32.mrf.mxu0  ;;  %v534_v15 = vpop.f32.mrf.mxu1 }
  0xdc   : > { %v359_v16 = vadd.f32 %v531_v14, %v262_v13  ;;  %v369_v17 = vadd.f32 %v534_v15, %v272_v12 }
  0xdd   : > { %v353_v18 = vpop.f32.mrf.mxu0  ;;  %v363_v19 = vpop.f32.mrf.mxu1 }
  0xde   : > { %373 = vst [vmem:[%s224_s5 + $0x8] sm:$0xff] %v359_v16  ;;  %375 = vst [vmem:[%s224_s5 + $0x18] sm:$0xff] %v369_v17  ;;  %v354_v20 = vadd.f32 %v353_v18, %v257_v11  ;;  %v364_v21 = vadd.f32 %v363_v19, %v267_v10 }
  0xe0   : > { %372 = vst [vmem:[%s224_s5] sm:$0xff] %v354_v20  ;;  %374 = vst [vmem:[%s224_s5 + $0x10] sm:$0xff] %v364_v21 }
  0xe1   : > { %610 = shalt.err (!%p607_p5)
}
  0xe2   : > { %s611_s23 = scalar_lea.hbm %s794_s10, 512  ;;  %s615_s28 = scalar_lea.hbm %s844_s3, 1024 }
  0xe3   : > { %p612_p6 = scmp.ne.s32.totalorder %s794_s10, %s611_s23  ;;  %p616_p10 = scmp.lt.s32.totalorder %s794_s10, %s844_s3 }
  0xe4   : > { %p617_p11 = scmp.lt.s32.totalorder %s615_s28, %s611_s23 }
  0xe5   : > { %p613_p7 = pnand %p612_p6, %p739_p4 }
  0xe6   : > { %p618_p12 = por %p617_p11, %p616_p10 }
  0xe7   : > { %p614_p9 = pneg %p613_p7 }
  0xe9   : > { %p619_p13 = pnand %p618_p12, %p614_p9 }
  0xeb   : > { %622 = shalt.err (!%p619_p13)
}
  0xec   : > { %s677_s4 = smov 128   ;;  %s678_s5 = smov 8  }
  0xed   : > { %537 = dma.vmem_to_hbm [thread:$0]  (%p739_p4), %s789_s6, 512, %s794_s10, %s796_s15, %s677_s4, %s677_s4, %s678_s5  }
  0xee PF: > { %p543_p0 = scmp.ge.s32.totalorder %s673_s17, 2  ;;  %s408_s7 = sand.u32 1, %s653_s12  }
  0xef   : > { %s409_s8 = scalar_lea.sflag [#allocation3], %s408_s7 }
  0xf0   : > { %p540_p1 = pnand %p543_p0, %p746_p8 }
  0xf2   : > { %p541_p2 = pneg %p540_p1 }
  0xf4   : > { %648 = dma.done.wait (%p541_p2), %s409_s8, 512  }
  0xf5   : > { %650 = vsyncadd (%p541_p2), %s409_s8, 4294966784  ;;  %s16_s17 = sadd.s32 1, %s673_s17   ;;  %s847_s12 = smov %s657_s13 }
  0xf6   : > { %p13_p3 = scmp.ge.s32.totalorder %s16_s17, 4   ;;  %s848_s13 = smov %s661_s14 }
  0xf7   : > { %s849_s14 = smov %s752_s25  ;;  %s850_s15 = smov %s669_s16 }
  0xf8   : > { %s851_s16 = smov %s853_s20  ;;  %15 = sbr.rel (!%p13_p3) target bundleno = 4 (0x4), region = 73 }
  0xfd   :  { %414 = vsyncpa [#allocation3], 1 }
  0xfe   :  { %416 = vsyncpa [#allocation3 + $0x1], 1 }

</bundles_post_ra>
